<compile_context>
chip_gen: v6e
topology: v6e:2x2x1
jax: 0.10.0
libtpu: 0.0.40
codegen_flags: <defaults>
</compile_context>

<pallas_src>
import jax
import jax.numpy as jnp
from jax import lax
from jax.experimental import pallas as pl
from jax.experimental.pallas import tpu as pltpu

_SUB = 8            # sublanes per vreg
_LANE = 128         # lanes per vreg
_CHUNK_LANES = 512  # lane width of one pipelined block (~400 KiB f32 at C=25)

# packed row layout offsets
_QP, _QG, _LO, _DH, _PT, _GT, _D0 = 0, 4, 8, 14, 16, 19, 22
_C = 25


def _round_up(x, m):
    return ((x + m - 1) // m) * m


def _traj_loss_kernel(r_ref, out_ref, acc_traj, acc_ang, acc_loc, acc_dh):
    """r_ref    : [25, 8, chunk]  packed operand (row layout above)
       out_ref  : [1, 8, 128]     raw partial sums for this grid split
                                  (lanes 0..3 = traj / angle / local / dhead)
       acc_*    : [8, chunk]      f32 partial-sum accumulators."""
    step = pl.program_id(1)

    @pl.when(step == 0)
    def _init():
        acc_traj[...] = jnp.zeros_like(acc_traj)
        acc_ang[...] = jnp.zeros_like(acc_ang)
        acc_loc[...] = jnp.zeros_like(acc_loc)
        acc_dh[...] = jnp.zeros_like(acc_dh)

    r = r_ref[...].astype(jnp.float32)        # cast in-kernel (hidden under DMA)

    # ---- trans MSE numerator: ((p - g) - (p0 - g0))^2 ----
    d = (r[_PT:_PT + 3] - r[_GT:_GT + 3]) - r[_D0:_D0 + 3]
    acc_traj[...] += jnp.sum(d * d, axis=0)

    # ---- geodesic angle of relative quaternion q_pred * conj(q_gt), squared ----
    w1, x1, y1, z1 = r[_QP + 0], r[_QP + 1], r[_QP + 2], r[_QP + 3]
    w2, x2, y2, z2 = r[_QG + 0], r[_QG + 1], r[_QG + 2], r[_QG + 3]
    rw = w1 * w2 + x1 * x2 + y1 * y2 + z1 * z2
    rx = -w1 * x2 + x1 * w2 - y1 * z2 + z1 * y2
    ry = -w1 * y2 + x1 * z2 + y1 * w2 - z1 * x2
    rz = -w1 * z2 - x1 * y2 + y1 * x2 + z1 * w2
    vec = jnp.sqrt(rx * rx + ry * ry + rz * rz)
    ang = 2.0 * jnp.arctan2(vec, jnp.abs(rw))   # padded lanes: atan2(0,0)=0
    acc_ang[...] += ang * ang

    # ---- local_orient / d_heading squared sums (one fused square pass) ----
    sq = r[_LO:_DH + 2] * r[_LO:_DH + 2]        # rows 8..15
    acc_loc[...] += jnp.sum(sq[0:6], axis=0)
    acc_dh[...] += jnp.sum(sq[6:8], axis=0)

    @pl.when(step == pl.num_programs(1) - 1)
    def _finalize():
        s_traj = jnp.sum(acc_traj[...])
        s_ang = jnp.sum(acc_ang[...])
        s_loc = jnp.sum(acc_loc[...])
        s_dh = jnp.sum(acc_dh[...])
        lane = lax.broadcasted_iota(jnp.int32, (1, 8, 128), 2)
        packed = jnp.where(lane == 0, s_traj,
                 jnp.where(lane == 1, s_ang,
                 jnp.where(lane == 2, s_loc,
                 jnp.where(lane == 3, s_dh, 0.0))))
        out_ref[...] = packed.astype(jnp.float32)


def _rows(x, dtype):
    """[T, B, 1, c] -> [c, T*B] (per-tensor transpose, fused into the pack)."""
    t, b, _, c = x.shape
    return jnp.transpose(x.astype(dtype).reshape(t * b, c), (1, 0))


def traj_loss(pred, gt):
    """Pallas implementation of TrajLoss.forward -> (loss, loss_dict)."""
    p_t = pred['out_trans_tp']
    g_t = gt['w_transl_tp']
    q_p = pred['out_orient_q_tp']
    q_g = gt['w_orient_q_tp']
    loc = pred['local_orient']
    dhd = pred['d_heading_vec']

    t, b = p_t.shape[0], p_t.shape[1]
    n = t * b
    dtype = jnp.result_type(p_t, g_t, q_p, q_g, loc, dhd)  # keep native dtype

    # frame-0 trans delta, broadcast over T (avoids a periodic lane gather)
    d0 = (p_t[0] - g_t[0]).astype(dtype).reshape(b, 3)                 # [B, 3]
    d0_rows = jnp.broadcast_to(
        jnp.transpose(d0, (1, 0))[:, None, :], (3, t, b)).reshape(3, n)

    rows = jnp.concatenate([
        _rows(q_p, dtype), _rows(q_g, dtype),                          # 0..7
        _rows(loc, dtype), _rows(dhd, dtype),                          # 8..15
        _rows(p_t, dtype), _rows(g_t, dtype), d0_rows,                 # 16..24
    ], axis=0)                                                         # [25, N]

    # lane geometry: distribute N over 8 sublanes x m lanes, zero-pad the tail.
    m = _round_up(max(1, -(-n // _SUB)), _LANE)
    if m <= _CHUNK_LANES:
        chunk = m
    else:
        chunk = _CHUNK_LANES
        m = _round_up(m, chunk)
    num_chunks = m // chunk
    n_splits = 2 if num_chunks >= 2 else 1      # 2 TensorCores on v7x
    if num_chunks % n_splits:
        num_chunks = _round_up(num_chunks, n_splits)
        m = num_chunks * chunk
    chunks_per_split = num_chunks // n_splits
    n_pad = _SUB * m

    rows = jnp.pad(rows, ((0, 0), (0, n_pad - n))).reshape(_C, _SUB, m)

    grid_spec = pltpu.PrefetchScalarGridSpec(
        num_scalar_prefetch=0,
        grid=(n_splits, chunks_per_split),
        in_specs=[pl.BlockSpec(
            (_C, _SUB, chunk),
            lambda c, i: (0, 0, c * chunks_per_split + i))],
        out_specs=pl.BlockSpec((1, 8, 128), lambda c, i: (c, 0, 0)),
        scratch_shapes=[pltpu.VMEM((_SUB, chunk), jnp.float32)
                        for _ in range(4)],
    )

    out = pl.pallas_call(
        _traj_loss_kernel,
        out_shape=jax.ShapeDtypeStruct((n_splits, 8, 128), jnp.float32),
        grid_spec=grid_spec,
        compiler_params=pltpu.CompilerParams(
            dimension_semantics=("parallel", "arbitrary")),
    )(rows)

    # Combine per-core raw sums; divide by TRUE element counts once.
    sums = jnp.sum(out[:, 0, 0:4], axis=0)      # (4,)
    inv_n = 1.0 / float(n)
    loss_traj = sums[0] * (inv_n / 3.0)
    loss_orient = sums[1] * inv_n
    loss_local = sums[2] * (0.1 * inv_n / 6.0)
    loss_dhead = sums[3] * (0.1 * inv_n / 2.0)
    loss_commit = jnp.asarray(pred['commit_loss'], jnp.float32) * 0.001
    total = loss_traj + loss_orient + loss_commit + loss_local + loss_dhead

    loss_dict = {'traj': loss_traj, 'orient': loss_orient, 'commit': loss_commit,
                 'local_head': loss_local, 'dheading': loss_dhead}
    return total, loss_dict


def traj_loss_ref(pred, gt):
    """Pure-JAX reference (same math, original [T,B,1,C] layout, original op order)."""
    p, g = pred['out_trans_tp'], gt['w_transl_tp']
    loss_traj = jnp.mean(((p - p[:1]) - (g - g[:1])) ** 2)
    q1, q2 = pred['out_orient_q_tp'], gt['w_orient_q_tp']
    w1, x1, y1, z1 = [q1[..., i] for i in range(4)]
    w2, x2, y2, z2 = [q2[..., i] for i in range(4)]
    rw = w1 * w2 + x1 * x2 + y1 * y2 + z1 * z2
    rx = -w1 * x2 + x1 * w2 - y1 * z2 + z1 * y2
    ry = -w1 * y2 + x1 * z2 + y1 * w2 - z1 * x2
    rz = -w1 * z2 - x1 * y2 + y1 * x2 + z1 * w2
    ang = 2.0 * jnp.arctan2(jnp.sqrt(rx ** 2 + ry ** 2 + rz ** 2), jnp.abs(rw))
    loss_orient = jnp.mean(ang ** 2)
    loss_commit = jnp.asarray(pred['commit_loss'], jnp.float32) * 0.001
    loss_local = jnp.mean(pred['local_orient'] ** 2) * 0.1
    loss_dh = jnp.mean(pred['d_heading_vec'] ** 2) * 0.1
    return loss_traj + loss_orient + loss_commit + loss_local + loss_dh


if __name__ == "__main__":
    def _make_inputs(key, t, b):
        ks = jax.random.split(key, 8)

        def _unit_quat(k):
            q = jax.random.normal(k, (t, b, 1, 4), jnp.float32)
            return q / jnp.linalg.norm(q, axis=-1, keepdims=True)

        pred = {
            'out_trans_tp':     jax.random.normal(ks[0], (t, b, 1, 3), jnp.float32),
            'out_orient_q_tp':  _unit_quat(ks[1]),
            'out_orient_6d_tp': jax.random.normal(ks[2], (t, b, 1, 6), jnp.float32),
            'local_orient':     jax.random.normal(ks[3], (t, b, 1, 6), jnp.float32),
            'd_heading_vec':    jax.random.normal(ks[4], (t, b, 1, 2), jnp.float32),
            'commit_loss':      jnp.float32(0.37),
        }
        gt_trans = jax.random.normal(ks[5], (t, b, 1, 3), jnp.float32)
        gt_trans = gt_trans.at[0].set(0.0)  # init frame [0,0,0] per docstring
        gt = {
            'w_transl_tp':    gt_trans,
            'w_orient_q_tp':  _unit_quat(ks[6]),
            'w_orient_6d_tp': jax.random.normal(ks[7], (t, b, 1, 6), jnp.float32),
        }
        return pred, gt

    key = jax.random.PRNGKey(0)
    k_small, k_big = jax.random.split(key)

    # Small canonical case (single grid step).
    pred, gt = _make_inputs(k_small, 8, 2)
    total, loss_dict = traj_loss(pred, gt)
    total = jax.block_until_ready(total)
    ref_total = traj_loss_ref(pred, gt)
    assert jnp.allclose(total, ref_total, rtol=1e-5, atol=1e-5), (total, ref_total)
    assert jnp.allclose(total, sum(loss_dict.values()), rtol=1e-5, atol=1e-5)

    # Larger case exercising the chunked grid, the 2-way split and lane padding.
    pred2, gt2 = _make_inputs(k_big, 750, 16)
    total2, _ = traj_loss(pred2, gt2)
    total2 = jax.block_until_ready(total2)
    ref_total2 = traj_loss_ref(pred2, gt2)
    assert jnp.allclose(total2, ref_total2, rtol=1e-4, atol=1e-5), (total2, ref_total2)

    print("KERNEL_OK")
</pallas_src>

<mosaic_0001>
module attributes {stable_mosaic.version = 11 : i64} {
  func.func @_traj_loss_kernel(%arg0: i32, %arg1: i32, %arg2: memref<25x8x128xf32, #tpu.memory_space<vmem>>, %arg3: memref<1x8x128xf32, #tpu.memory_space<vmem>>, %arg4: memref<8x128xf32, #tpu.memory_space<vmem>>, %arg5: memref<8x128xf32, #tpu.memory_space<vmem>>, %arg6: memref<8x128xf32, #tpu.memory_space<vmem>>, %arg7: memref<8x128xf32, #tpu.memory_space<vmem>>) attributes {dimension_semantics = [#tpu.dimension_semantics<parallel>, #tpu.dimension_semantics<arbitrary>], iteration_bounds = array<i64: 1, 1>, scalar_prefetch = 0 : i64, scratch_operands = 4 : i64, tpu.core_type = #tpu.core_type<tc>, window_params = [{transform_indices = @transform_0, window_bounds = array<i64: 25, 8, 128>}, {transform_indices = @transform_1, window_bounds = array<i64: 1, 8, 128>}]} {
    %c0_i32 = arith.constant 0 : i32
    %0 = arith.cmpi eq, %arg1, %c0_i32 : i32
    %1 = arith.extui %0 : i1 to i32
    %c0_i32_0 = arith.constant 0 : i32
    %2 = arith.cmpi ne, %1, %c0_i32_0 : i32
    scf.if %2 {
      %cst_27 = arith.constant 0.000000e+00 : f32
      %94 = vector.broadcast %cst_27 : f32 to vector<8x128xf32>
      %c0_28 = arith.constant 0 : index
      %c0_29 = arith.constant 0 : index
      %95 = vector.load %arg4[%c0_28, %c0_29] : memref<8x128xf32, #tpu.memory_space<vmem>>, vector<8x128xf32>
      tpu.vector_store %arg4[%c0_28, %c0_29], %94 {strides = array<i32>} : memref<8x128xf32, #tpu.memory_space<vmem>>, vector<8x128xf32>,
      %cst_30 = arith.constant 0.000000e+00 : f32
      %96 = vector.broadcast %cst_30 : f32 to vector<8x128xf32>
      %c0_31 = arith.constant 0 : index
      %c0_32 = arith.constant 0 : index
      %97 = vector.load %arg5[%c0_31, %c0_32] : memref<8x128xf32, #tpu.memory_space<vmem>>, vector<8x128xf32>
      tpu.vector_store %arg5[%c0_31, %c0_32], %96 {strides = array<i32>} : memref<8x128xf32, #tpu.memory_space<vmem>>, vector<8x128xf32>,
      %cst_33 = arith.constant 0.000000e+00 : f32
      %98 = vector.broadcast %cst_33 : f32 to vector<8x128xf32>
      %c0_34 = arith.constant 0 : index
      %c0_35 = arith.constant 0 : index
      %99 = vector.load %arg6[%c0_34, %c0_35] : memref<8x128xf32, #tpu.memory_space<vmem>>, vector<8x128xf32>
      tpu.vector_store %arg6[%c0_34, %c0_35], %98 {strides = array<i32>} : memref<8x128xf32, #tpu.memory_space<vmem>>, vector<8x128xf32>,
      %cst_36 = arith.constant 0.000000e+00 : f32
      %100 = vector.broadcast %cst_36 : f32 to vector<8x128xf32>
      %c0_37 = arith.constant 0 : index
      %c0_38 = arith.constant 0 : index
      %101 = vector.load %arg7[%c0_37, %c0_38] : memref<8x128xf32, #tpu.memory_space<vmem>>, vector<8x128xf32>
      tpu.vector_store %arg7[%c0_37, %c0_38], %100 {strides = array<i32>} : memref<8x128xf32, #tpu.memory_space<vmem>>, vector<8x128xf32>,
    } else {
    }
    %c0 = arith.constant 0 : index
    %c0_1 = arith.constant 0 : index
    %c0_2 = arith.constant 0 : index
    %3 = vector.load %arg2[%c0, %c0_1, %c0_2] : memref<25x8x128xf32, #tpu.memory_space<vmem>>, vector<25x8x128xf32>
    %4 = vector.extract_strided_slice %3 {offsets = [16, 0, 0], sizes = [3, 8, 128], strides = [1, 1, 1]} : vector<25x8x128xf32> to vector<3x8x128xf32>
    %5 = vector.extract_strided_slice %3 {offsets = [19, 0, 0], sizes = [3, 8, 128], strides = [1, 1, 1]} : vector<25x8x128xf32> to vector<3x8x128xf32>
    %6 = arith.subf %4, %5 : vector<3x8x128xf32>
    %7 = vector.extract_strided_slice %3 {offsets = [22, 0, 0], sizes = [3, 8, 128], strides = [1, 1, 1]} : vector<25x8x128xf32> to vector<3x8x128xf32>
    %8 = arith.subf %6, %7 : vector<3x8x128xf32>
    %c0_3 = arith.constant 0 : index
    %c0_4 = arith.constant 0 : index
    %9 = vector.load %arg4[%c0_3, %c0_4] : memref<8x128xf32, #tpu.memory_space<vmem>>, vector<8x128xf32>
    %10 = arith.mulf %8, %8 : vector<3x8x128xf32>
    %cst = arith.constant dense<0.000000e+00> : vector<8x128xf32>
    %11 = vector.multi_reduction <add>, %10, %cst [0] : vector<3x8x128xf32> to vector<8x128xf32>
    %12 = arith.addf %9, %11 : vector<8x128xf32>
    %c0_5 = arith.constant 0 : index
    %c0_6 = arith.constant 0 : index
    %13 = vector.load %arg4[%c0_5, %c0_6] : memref<8x128xf32, #tpu.memory_space<vmem>>, vector<8x128xf32>
    tpu.vector_store %arg4[%c0_5, %c0_6], %12 {strides = array<i32>} : memref<8x128xf32, #tpu.memory_space<vmem>>, vector<8x128xf32>,
    %14 = vector.extract_strided_slice %3 {offsets = [0, 0, 0], sizes = [1, 8, 128], strides = [1, 1, 1]} : vector<25x8x128xf32> to vector<1x8x128xf32>
    %15 = vector.shape_cast %14 : vector<1x8x128xf32> to vector<8x128xf32>
    %16 = vector.extract_strided_slice %3 {offsets = [1, 0, 0], sizes = [1, 8, 128], strides = [1, 1, 1]} : vector<25x8x128xf32> to vector<1x8x128xf32>
    %17 = vector.shape_cast %16 : vector<1x8x128xf32> to vector<8x128xf32>
    %18 = vector.extract_strided_slice %3 {offsets = [2, 0, 0], sizes = [1, 8, 128], strides = [1, 1, 1]} : vector<25x8x128xf32> to vector<1x8x128xf32>
    %19 = vector.shape_cast %18 : vector<1x8x128xf32> to vector<8x128xf32>
    %20 = vector.extract_strided_slice %3 {offsets = [3, 0, 0], sizes = [1, 8, 128], strides = [1, 1, 1]} : vector<25x8x128xf32> to vector<1x8x128xf32>
    %21 = vector.shape_cast %20 : vector<1x8x128xf32> to vector<8x128xf32>
    %22 = vector.extract_strided_slice %3 {offsets = [4, 0, 0], sizes = [1, 8, 128], strides = [1, 1, 1]} : vector<25x8x128xf32> to vector<1x8x128xf32>
    %23 = vector.shape_cast %22 : vector<1x8x128xf32> to vector<8x128xf32>
    %24 = vector.extract_strided_slice %3 {offsets = [5, 0, 0], sizes = [1, 8, 128], strides = [1, 1, 1]} : vector<25x8x128xf32> to vector<1x8x128xf32>
    %25 = vector.shape_cast %24 : vector<1x8x128xf32> to vector<8x128xf32>
    %26 = vector.extract_strided_slice %3 {offsets = [6, 0, 0], sizes = [1, 8, 128], strides = [1, 1, 1]} : vector<25x8x128xf32> to vector<1x8x128xf32>
    %27 = vector.shape_cast %26 : vector<1x8x128xf32> to vector<8x128xf32>
    %28 = vector.extract_strided_slice %3 {offsets = [7, 0, 0], sizes = [1, 8, 128], strides = [1, 1, 1]} : vector<25x8x128xf32> to vector<1x8x128xf32>
    %29 = vector.shape_cast %28 : vector<1x8x128xf32> to vector<8x128xf32>
    %30 = arith.mulf %15, %23 : vector<8x128xf32>
    %31 = arith.mulf %17, %25 : vector<8x128xf32>
    %32 = arith.addf %30, %31 : vector<8x128xf32>
    %33 = arith.mulf %19, %27 : vector<8x128xf32>
    %34 = arith.addf %32, %33 : vector<8x128xf32>
    %35 = arith.mulf %21, %29 : vector<8x128xf32>
    %36 = arith.addf %34, %35 : vector<8x128xf32>
    %cst_7 = arith.constant 0.000000e+00 : f32
    %37 = vector.broadcast %cst_7 : f32 to vector<8x128xf32>
    %38 = arith.subf %37, %15 : vector<8x128xf32>
    %39 = arith.mulf %38, %25 : vector<8x128xf32>
    %40 = arith.mulf %17, %23 : vector<8x128xf32>
    %41 = arith.addf %39, %40 : vector<8x128xf32>
    %42 = arith.mulf %19, %29 : vector<8x128xf32>
    %43 = arith.subf %41, %42 : vector<8x128xf32>
    %44 = arith.mulf %21, %27 : vector<8x128xf32>
    %45 = arith.addf %43, %44 : vector<8x128xf32>
    %cst_8 = arith.constant 0.000000e+00 : f32
    %46 = vector.broadcast %cst_8 : f32 to vector<8x128xf32>
    %47 = arith.subf %46, %15 : vector<8x128xf32>
    %48 = arith.mulf %47, %27 : vector<8x128xf32>
    %49 = arith.mulf %17, %29 : vector<8x128xf32>
    %50 = arith.addf %48, %49 : vector<8x128xf32>
    %51 = arith.mulf %19, %23 : vector<8x128xf32>
    %52 = arith.addf %50, %51 : vector<8x128xf32>
    %53 = arith.mulf %21, %25 : vector<8x128xf32>
    %54 = arith.subf %52, %53 : vector<8x128xf32>
    %cst_9 = arith.constant 0.000000e+00 : f32
    %55 = vector.broadcast %cst_9 : f32 to vector<8x128xf32>
    %56 = arith.subf %55, %15 : vector<8x128xf32>
    %57 = arith.mulf %56, %29 : vector<8x128xf32>
    %58 = arith.mulf %17, %27 : vector<8x128xf32>
    %59 = arith.subf %57, %58 : vector<8x128xf32>
    %60 = arith.mulf %19, %25 : vector<8x128xf32>
    %61 = arith.addf %59, %60 : vector<8x128xf32>
    %62 = arith.mulf %21, %23 : vector<8x128xf32>
    %63 = arith.addf %61, %62 : vector<8x128xf32>
    %64 = arith.mulf %45, %45 : vector<8x128xf32>
    %65 = arith.mulf %54, %54 : vector<8x128xf32>
    %66 = arith.addf %64, %65 : vector<8x128xf32>
    %67 = arith.mulf %63, %63 : vector<8x128xf32>
    %68 = arith.addf %66, %67 : vector<8x128xf32>
    %69 = math.sqrt %68 : vector<8x128xf32>
    %70 = math.absf %36 : vector<8x128xf32>
    %71 = math.atan2 %69, %70 : vector<8x128xf32>
    %cst_10 = arith.constant 2.000000e+00 : f32
    %72 = vector.broadcast %cst_10 : f32 to vector<8x128xf32>
    %73 = arith.mulf %72, %71 : vector<8x128xf32>
    %c0_11 = arith.constant 0 : index
    %c0_12 = arith.constant 0 : index
    %74 = vector.load %arg5[%c0_11, %c0_12] : memref<8x128xf32, #tpu.memory_space<vmem>>, vector<8x128xf32>
    %75 = arith.mulf %73, %73 : vector<8x128xf32>
    %76 = arith.addf %74, %75 : vector<8x128xf32>
    %c0_13 = arith.constant 0 : index
    %c0_14 = arith.constant 0 : index
    %77 = vector.load %arg5[%c0_13, %c0_14] : memref<8x128xf32, #tpu.memory_space<vmem>>, vector<8x128xf32>
    tpu.vector_store %arg5[%c0_13, %c0_14], %76 {strides = array<i32>} : memref<8x128xf32, #tpu.memory_space<vmem>>, vector<8x128xf32>,
    %78 = vector.extract_strided_slice %3 {offsets = [8, 0, 0], sizes = [8, 8, 128], strides = [1, 1, 1]} : vector<25x8x128xf32> to vector<8x8x128xf32>
    %79 = vector.extract_strided_slice %3 {offsets = [8, 0, 0], sizes = [8, 8, 128], strides = [1, 1, 1]} : vector<25x8x128xf32> to vector<8x8x128xf32>
    %80 = arith.mulf %78, %79 : vector<8x8x128xf32>
    %c0_15 = arith.constant 0 : index
    %c0_16 = arith.constant 0 : index
    %81 = vector.load %arg6[%c0_15, %c0_16] : memref<8x128xf32, #tpu.memory_space<vmem>>, vector<8x128xf32>
    %82 = vector.extract_strided_slice %80 {offsets = [0, 0, 0], sizes = [6, 8, 128], strides = [1, 1, 1]} : vector<8x8x128xf32> to vector<6x8x128xf32>
    %cst_17 = arith.constant dense<0.000000e+00> : vector<8x128xf32>
    %83 = vector.multi_reduction <add>, %82, %cst_17 [0] : vector<6x8x128xf32> to vector<8x128xf32>
    %84 = arith.addf %81, %83 : vector<8x128xf32>
    %c0_18 = arith.constant 0 : index
    %c0_19 = arith.constant 0 : index
    %85 = vector.load %arg6[%c0_18, %c0_19] : memref<8x128xf32, #tpu.memory_space<vmem>>, vector<8x128xf32>
    tpu.vector_store %arg6[%c0_18, %c0_19], %84 {strides = array<i32>} : memref<8x128xf32, #tpu.memory_space<vmem>>, vector<8x128xf32>,
    %c0_20 = arith.constant 0 : index
    %c0_21 = arith.constant 0 : index
    %86 = vector.load %arg7[%c0_20, %c0_21] : memref<8x128xf32, #tpu.memory_space<vmem>>, vector<8x128xf32>
    %87 = vector.extract_strided_slice %80 {offsets = [6, 0, 0], sizes = [2, 8, 128], strides = [1, 1, 1]} : vector<8x8x128xf32> to vector<2x8x128xf32>
    %cst_22 = arith.constant dense<0.000000e+00> : vector<8x128xf32>
    %88 = vector.multi_reduction <add>, %87, %cst_22 [0] : vector<2x8x128xf32> to vector<8x128xf32>
    %89 = arith.addf %86, %88 : vector<8x128xf32>
    %c0_23 = arith.constant 0 : index
    %c0_24 = arith.constant 0 : index
    %90 = vector.load %arg7[%c0_23, %c0_24] : memref<8x128xf32, #tpu.memory_space<vmem>>, vector<8x128xf32>
    tpu.vector_store %arg7[%c0_23, %c0_24], %89 {strides = array<i32>} : memref<8x128xf32, #tpu.memory_space<vmem>>, vector<8x128xf32>,
    %c0_i32_25 = arith.constant 0 : i32
    %91 = arith.cmpi eq, %arg1, %c0_i32_25 : i32
    %92 = arith.extui %91 : i1 to i32
    %c0_i32_26 = arith.constant 0 : i32
    %93 = arith.cmpi ne, %92, %c0_i32_26 : i32
    scf.if %93 {
      %c0_27 = arith.constant 0 : index
      %c0_28 = arith.constant 0 : index
      %94 = vector.load %arg4[%c0_27, %c0_28] : memref<8x128xf32, #tpu.memory_space<vmem>>, vector<8x128xf32>
      %95 = vector.shape_cast %94 : vector<8x128xf32> to vector<1x8x128xf32>
      %cst_29 = arith.constant dense<0.000000e+00> : vector<1xf32>
      %96 = vector.multi_reduction <add>, %95, %cst_29 [1, 2] : vector<1x8x128xf32> to vector<1xf32>
      %97 = vector.shape_cast %96 : vector<1xf32> to vector<1x1x1xf32>
      %98 = vector.extract %97[0, 0, 0] : f32 from vector<1x1x1xf32>
      %c0_30 = arith.constant 0 : index
      %c0_31 = arith.constant 0 : index
      %99 = vector.load %arg5[%c0_30, %c0_31] : memref<8x128xf32, #tpu.memory_space<vmem>>, vector<8x128xf32>
      %100 = vector.shape_cast %99 : vector<8x128xf32> to vector<1x8x128xf32>
      %cst_32 = arith.constant dense<0.000000e+00> : vector<1xf32>
      %101 = vector.multi_reduction <add>, %100, %cst_32 [1, 2] : vector<1x8x128xf32> to vector<1xf32>
      %102 = vector.shape_cast %101 : vector<1xf32> to vector<1x1x1xf32>
      %103 = vector.extract %102[0, 0, 0] : f32 from vector<1x1x1xf32>
      %c0_33 = arith.constant 0 : index
      %c0_34 = arith.constant 0 : index
      %104 = vector.load %arg6[%c0_33, %c0_34] : memref<8x128xf32, #tpu.memory_space<vmem>>, vector<8x128xf32>
      %105 = vector.shape_cast %104 : vector<8x128xf32> to vector<1x8x128xf32>
      %cst_35 = arith.constant dense<0.000000e+00> : vector<1xf32>
      %106 = vector.multi_reduction <add>, %105, %cst_35 [1, 2] : vector<1x8x128xf32> to vector<1xf32>
      %107 = vector.shape_cast %106 : vector<1xf32> to vector<1x1x1xf32>
      %108 = vector.extract %107[0, 0, 0] : f32 from vector<1x1x1xf32>
      %c0_36 = arith.constant 0 : index
      %c0_37 = arith.constant 0 : index
      %109 = vector.load %arg7[%c0_36, %c0_37] : memref<8x128xf32, #tpu.memory_space<vmem>>, vector<8x128xf32>
      %110 = vector.shape_cast %109 : vector<8x128xf32> to vector<1x8x128xf32>
      %cst_38 = arith.constant dense<0.000000e+00> : vector<1xf32>
      %111 = vector.multi_reduction <add>, %110, %cst_38 [1, 2] : vector<1x8x128xf32> to vector<1xf32>
      %112 = vector.shape_cast %111 : vector<1xf32> to vector<1x1x1xf32>
      %113 = vector.extract %112[0, 0, 0] : f32 from vector<1x1x1xf32>
      %114 = tpu.iota {dimensions = array<i32: 2>} : vector<1x8x128xi32>
      %c0_i32_39 = arith.constant 0 : i32
      %115 = vector.broadcast %c0_i32_39 : i32 to vector<1x8x128xi32>
      %116 = arith.cmpi eq, %114, %115 : vector<1x8x128xi32>
      %c1_i32 = arith.constant 1 : i32
      %117 = vector.broadcast %c1_i32 : i32 to vector<1x8x128xi32>
      %118 = arith.cmpi eq, %114, %117 : vector<1x8x128xi32>
      %c2_i32 = arith.constant 2 : i32
      %119 = vector.broadcast %c2_i32 : i32 to vector<1x8x128xi32>
      %120 = arith.cmpi eq, %114, %119 : vector<1x8x128xi32>
      %c3_i32 = arith.constant 3 : i32
      %121 = vector.broadcast %c3_i32 : i32 to vector<1x8x128xi32>
      %122 = arith.cmpi eq, %114, %121 : vector<1x8x128xi32>
      %cst_40 = arith.constant 0.000000e+00 : f32
      %123 = vector.broadcast %113 : f32 to vector<1x8x128xf32>
      %124 = vector.broadcast %cst_40 : f32 to vector<1x8x128xf32>
      %125 = arith.select %122, %123, %124 : vector<1x8x128xi1>, vector<1x8x128xf32>
      %126 = vector.broadcast %108 : f32 to vector<1x8x128xf32>
      %127 = arith.select %120, %126, %125 : vector<1x8x128xi1>, vector<1x8x128xf32>
      %128 = vector.broadcast %103 : f32 to vector<1x8x128xf32>
      %129 = arith.select %118, %128, %127 : vector<1x8x128xi1>, vector<1x8x128xf32>
      %130 = vector.broadcast %98 : f32 to vector<1x8x128xf32>
      %131 = arith.select %116, %130, %129 : vector<1x8x128xi1>, vector<1x8x128xf32>
      %c0_41 = arith.constant 0 : index
      %c0_42 = arith.constant 0 : index
      %c0_43 = arith.constant 0 : index
      %132 = vector.load %arg3[%c0_41, %c0_42, %c0_43] : memref<1x8x128xf32, #tpu.memory_space<vmem>>, vector<1x8x128xf32>
      tpu.vector_store %arg3[%c0_41, %c0_42, %c0_43], %131 {strides = array<i32>} : memref<1x8x128xf32, #tpu.memory_space<vmem>>, vector<1x8x128xf32>,
    } else {
    }
    return
  }
  func.func @transform_0(%arg0: i32, %arg1: i32) -> (i32, i32, i32) {
    %c1_i32 = arith.constant 1 : i32
    %0 = arith.muli %arg0, %c1_i32 : i32
    %1 = arith.addi %0, %arg1 : i32
    %c0_i32 = arith.constant 0 : i32
    %c0_i32_0 = arith.constant 0 : i32
    %c0_i32_1 = arith.constant 0 : i32
    return %c0_i32, %c0_i32_0, %1 : i32, i32, i32
  }
  func.func @transform_1(%arg0: i32, %arg1: i32) -> (i32, i32, i32) {
    %c0_i32 = arith.constant 0 : i32
    %c0_i32_0 = arith.constant 0 : i32
    %c0_i32_1 = arith.constant 0 : i32
    return %arg0, %c0_i32, %c0_i32_0 : i32, i32, i32
  }
}

</mosaic_0001>

<bundles_post_ra>
// kernel: tpu_custom_call.1
= control target key start
LH: loop header
LB: loop body
LE: loop exit
PB: predicated region body
PF: predicated region fallthrough
CT: control target
= control target key end

     0   :  { %6 = vsyncpa [#allocation7], 0  ;;  %s341_s0 = inlined_call_operand.hbm [shape: f32[25,8,128], index: 0, kind: input, shape index: {}]   ;;  %s342_s1 = inlined_call_operand.hbm [shape: f32[1,8,128], index: 1, kind: output, shape index: {}]  }
   0x1   :  { %7 = vsyncpa [#allocation8], 0  ;;  %s320_s6 = smov [#allocation6]  }
   0x2   :  { %s16_s7 = sshll.u32 %s320_s6, 4  ;;  %s17_s7 = int_to_ptr.vmem [resolvable:$true] %s16_s7 }
   0x3   :  { %s284_s8 = scalar_lea.vmem %s17_s7, 3200  ;;  %p289_p1 = scmp.lt.s32.totalorder %s17_s7, %s17_s7 }
   0x4   :  { %p285_p0 = scmp.ne.s32.totalorder %s17_s7, %s284_s8  ;;  %p290_p2 = scmp.lt.s32.totalorder %s284_s8, %s284_s8 }
   0x6   :  { %p291_p3 = por %p290_p2, %p289_p1 }
   0x8   :  { %p292_p4 = pnand %p291_p3, %p285_p0 }
   0xa   :  { %295 = shalt.err (!%p292_p4)
}
   0xb   :  { %s321_s9 = smov 128   ;;  %s322_s10 = smov 8  }
   0xc   :  { %22 = dma.hbm_to_vmem [thread:$0]  %s341_s0, 3200, %s17_s7, [#allocation7], %s321_s9, %s321_s9, %s322_s10  }
   0xd   :  { %316 = dma.done.wait [#allocation7], 3200  }
   0xe   :  { %317 = vsyncadd [#allocation7], 4294964096  ;;  %v51_v0 = vld [vmem:[#allocation6 + $0x80] sm:$0xff]  ;;  %v52_v1 = vld [vmem:[#allocation6 + $0x88] sm:$0xff]  ;;  %s324_s16 = smov [#allocation9]  }
   0xf   :  { %v53_v2 = vld [vmem:[#allocation6 + $0x90] sm:$0xff]  ;;  %v54_v3 = vld [vmem:[#allocation6 + $0x98] sm:$0xff]  ;;  %v55_v4 = vld [vmem:[#allocation6 + $0xa0] sm:$0xff]  ;;  %s250_s17 = sshll.u32 %s324_s16, 4  ;;  %s251_s17 = int_to_ptr.vmem [resolvable:$true] %s250_s17 }
  0x10   :  { %v56_v5 = vld [vmem:[#allocation6 + $0xa8] sm:$0xff]  ;;  %v57_v6 = vld [vmem:[#allocation6 + $0xb0] sm:$0xff]  ;;  %v58_v7 = vld [vmem:[#allocation6 + $0xb8] sm:$0xff]  ;;  %v60_v9 = vsub.f32 %v51_v0, %v54_v3  ;;  %v61_v10 = vsub.f32 %v52_v1, %v55_v4  ;;  %s296_s18 = scalar_lea.vmem %s251_s17, 128  ;;  %p301_p6 = scmp.lt.s32.totalorder %s251_s17, %s251_s17 }
  0x11   :  { %v59_v8 = vld [vmem:[#allocation6 + $0xc0] sm:$0xff]  ;;  %v62_v11 = vsub.f32 %v53_v2, %v56_v5  ;;  %v44_v13 = vld [vmem:[#allocation6 + $0x48] sm:$0xff]  ;;  %v45_v14 = vld [vmem:[#allocation6 + $0x50] sm:$0xff]  ;;  %p297_p5 = scmp.ne.s32.totalorder %s251_s17, %s296_s18  ;;  %p302_p7 = scmp.lt.s32.totalorder %s296_s18, %s296_s18 }
  0x12   :  { %v43_v12 = vld [vmem:[#allocation6 + $0x40] sm:$0xff]  ;;  %v63_v15 = vsub.f32 %v60_v9, %v57_v6  ;;  %v64_v16 = vsub.f32 %v61_v10, %v58_v7  ;;  %v46_v18 = vld [vmem:[#allocation6 + $0x58] sm:$0xff]  ;;  %v167_v21 = vmul.f32 %v44_v13, %v44_v13  ;;  %v168_v22 = vmul.f32 %v45_v14, %v45_v14  ;;  %v48_v27 = vld [vmem:[#allocation6 + $0x68] sm:$0xff] }
  0x13   :  { %v65_v17 = vsub.f32 %v62_v11, %v59_v8  ;;  %v166_v19 = vmul.f32 %v43_v12, %v43_v12  ;;  %v47_v20 = vld [vmem:[#allocation6 + $0x60] sm:$0xff]  ;;  %v49_v28 = vld [vmem:[#allocation6 + $0x70] sm:$0xff]  ;;  %v36_v29 = vld [vmem:[#allocation6 + $0x8] sm:$0xff]  ;;  %v169_v30 = vmul.f32 %v46_v18, %v46_v18  ;;  %v171_v41 = vmul.f32 %v48_v27, %v48_v27  ;;  %p303_p8 = por %p302_p7, %p301_p6 }
  0x14   :  { %v35_v23 = vld [vmem:[#allocation6] sm:$0xff]  ;;  %v67_v24 = vmul.f32 %v63_v15, %v63_v15  ;;  %v68_v25 = vmul.f32 %v64_v16, %v64_v16  ;;  %v37_v32 = vld [vmem:[#allocation6 + $0x10] sm:$0xff]  ;;  %v40_v34 = vld [vmem:[#allocation6 + $0x28] sm:$0xff]  ;;  %v170_v40 = vmul.f32 %v47_v20, %v47_v20  ;;  %v172_v46 = vmul.f32 %v49_v28, %v49_v28 }
  0x15   :  { %v69_v26 = vmul.f32 %v65_v17, %v65_v17  ;;  %v175_v31 = vadd.f32 %v167_v21, %v166_v19  ;;  %v39_v33 = vld [vmem:[#allocation6 + $0x20] sm:$0xff]  ;;  %v81_v35 = vsub.f32 0.0, %v35_v23  ;;  %v50_v37 = vld [vmem:[#allocation6 + $0x78] sm:$0xff]  ;;  %v41_v38 = vld [vmem:[#allocation6 + $0x30] sm:$0xff]  ;;  %v99_v62 = vmul.f32 %v40_v34, %v37_v32  ;;  %p304_p9 = pnand %p303_p8, %p297_p5 }
  0x16   :  { %v70_v36 = vadd.f32 %v68_v25, %v67_v24  ;;  %v42_v39 = vld [vmem:[#allocation6 + $0x38] sm:$0xff]  ;;  %v83_v47 = vmul.f32 %v39_v33, %v36_v29  ;;  %v173_v50 = vmul.f32 %v50_v37, %v50_v37  ;;  %v92_v55 = vmul.f32 %v39_v33, %v37_v32 }
  0x17   :  { %v176_v42 = vadd.f32 %v175_v31, %v168_v22  ;;  %v38_v43 = vld [vmem:[#allocation6 + $0x18] sm:$0xff]  ;;  %v82_v44 = vmul.f32 %v81_v35, %v40_v34  ;;  %v85_v48 = vmul.f32 %v42_v39, %v37_v32  ;;  %v89_v51 = vmul.f32 %v81_v35, %v41_v38 }
  0x18   :  { %v71_v45 = vadd.f32 %v70_v36, %v69_v26  ;;  %v90_v52 = vmul.f32 %v42_v39, %v36_v29  ;;  %v87_v54 = vmul.f32 %v41_v38, %v38_v43  ;;  %v94_v56 = vmul.f32 %v40_v34, %v38_v43 }
  0x19   :  { %v177_v49 = vadd.f32 %v176_v42, %v169_v30  ;;  %v84_v53 = vadd.f32 %v83_v47, %v82_v44  ;;  %v96_v59 = vmul.f32 %v81_v35, %v42_v39  ;;  %v97_v60 = vmul.f32 %v41_v38, %v36_v29 }
  0x1a   :  { %190 = vadd.xlane.f32.xlu0 %v71_v45  ;;  %v91_v58 = vadd.f32 %v90_v52, %v89_v51  ;;  %v101_v2 = vmul.f32 %v39_v33, %v38_v43  ;;  %v183_v4 = vadd.f32 %v173_v50, %v172_v46  ;;  %v74_v13 = vmul.f32 %v39_v33, %v35_v23 }
  0x1b   :  { %v178_v57 = vadd.f32 %v177_v49, %v170_v40  ;;  %v86_v61 = vsub.f32 %v84_v53, %v85_v48  ;;  %v98_v1 = vsub.f32 %v96_v59, %v97_v60  ;;  %v75_v14 = vmul.f32 %v40_v34, %v36_v29 }
  0x1c   :  { %v93_v0 = vadd.f32 %v92_v55, %v91_v58  ;;  %v77_v16 = vmul.f32 %v41_v38, %v37_v32  ;;  %v79_v18 = vmul.f32 %v42_v39, %v38_v43  ;;  %v323_v53 = vmov 0.7853982  }
  0x1d   :  { %v179_v63 = vadd.f32 %v178_v57, %v171_v41  ;;  %v88_v3 = vadd.f32 %v87_v54, %v86_v61  ;;  %v100_v6 = vadd.f32 %v99_v62, %v98_v1  ;;  %v76_v15 = vadd.f32 %v75_v14, %v74_v13 }
  0x1e   :  { %v95_v5 = vsub.f32 %v93_v0, %v94_v56 }
  0x1f   :  { %210 = vadd.xlane.f32.xlu1 %v179_v63  ;;  %v103_v7 = vmul.f32 %v88_v3, %v88_v3  ;;  %v102_v8 = vadd.f32 %v101_v2, %v100_v6  ;;  %v78_v17 = vadd.f32 %v77_v16, %v76_v15 }
  0x20   :  { %v104_v9 = vmul.f32 %v95_v5, %v95_v5 }
  0x21   :  { %v106_v11 = vmul.f32 %v102_v8, %v102_v8  ;;  %v80_v19 = vadd.f32 %v79_v18, %v78_v17 }
  0x22   :  { %v105_v10 = vadd.f32 %v104_v9, %v103_v7 }
  0x23   :  { %220 = vadd.xlane.f32.xlu1 %v183_v4  ;;  %v115_v25 = vand.u32 2147483647, %v80_v19 }
  0x24   :  { %v107_v12 = vadd.f32 %v106_v11, %v105_v10 }
  0x25   :  { %vm148_vm3 = vcmp.ne.f32.partialorder %v115_v25, %v115_v25  ;;  %vm143_vm5 = vcmp.lt.f32.partialorder %v115_v25, 0.0  ;;  %vm154_vm6 = vcmp.eq.s32.totalorder %v115_v25, inf }
  0x26   :  { %272 = vrsqrt.f32 %v107_v12  ;;  %vm110_vm0 = vcmp.eq.f32.partialorder %v107_v12, inf  ;;  %v113_v21 = vand.u32 2147483648, %v107_v12  ;;  %vm112_vm1 = vcmp.eq.f32.partialorder %v107_v12, 0.0 }
  0x27   :  { %v153_v54 = vsel %vm143_vm5, 2.3561945, %v323_v53 }
  0x33   :  { %v273_v20 = vpop.eup %272 }
  0x34   :  { %v109_v22 = vmul.f32 %v273_v20, %v107_v12 }
  0x36   :  { %v111_v24 = vsel %vm110_vm0, %v107_v12, %v109_v22 }
  0x37   :  { %v114_v26 = vsel %vm112_vm1, %v113_v21, %v111_v24 }
  0x38   :  { %v117_v27 = vand.u32 2147483647, %v114_v26  ;;  %vm149_vm4 = vcmp.ne.f32.partialorder %v114_v26, %v114_v26  ;;  %vm146_vm8 = vcmp.eq.f32.partialorder %v114_v26, 0.0  ;;  %v159_v57 = vand.u32 2147483648, %v114_v26 }
  0x39   :  { %vm150_vm9 = vmor %vm148_vm3, %vm149_vm4 }
  0x3a   :  { %v119_v28 = vmax.f32 %v115_v25, %v117_v27  ;;  %v118_v30 = vmin.f32 %v115_v25, %v117_v27  ;;  %vm140_vm2 = vcmp.gt.f32.partialorder %v117_v27, %v115_v25  ;;  %vm155_vm7 = vcmp.eq.s32.totalorder %v117_v27, inf }
  0x3b   :  { %vm156_vm10 = vmand %vm154_vm6, %vm155_vm7 }
  0x3c   :  { %274 = vrcp.f32 %v119_v28  ;;  %v229_v28 = vlaneseq }
  0x49   :  { %v275_v23 = vpop.eup %274 }
  0x4a   :  { %v121_v29 = vmul.f32 %v275_v23, %v118_v30  ;;  %v230_v30 = vand.u32 127, %v229_v28 }
  0x4c   :  { %v122_v31 = vmul.f32 %v121_v29, %v121_v29  ;;  %vm234_vm11 = vcmp.eq.s32.totalorder %v230_v30, 3  ;;  %vm233_vm12 = vcmp.eq.s32.totalorder %v230_v30, 2  ;;  %vm232_vm13 = vcmp.eq.s32.totalorder %v230_v30, 1 }
  0x4d   :  { %vm231_vm14 = vcmp.eq.s32.totalorder %v230_v30, 0 }
  0x4e   :  { %v123_v33 = vmul.f32 0.002785687, %v122_v31 }
  0x50   :  { %v124_v32 = vadd.f32 -0.015866, %v123_v33 }
  0x52   :  { %v125_v34 = vmul.f32 %v124_v32, %v122_v31 }
  0x54   :  { %v126_v35 = vadd.f32 0.04247222, %v125_v34 }
  0x56   :  { %v127_v36 = vmul.f32 %v126_v35, %v122_v31 }
  0x58   :  { %v128_v37 = vadd.f32 -0.074975304, %v127_v36 }
  0x5a   :  { %v129_v38 = vmul.f32 %v128_v37, %v122_v31 }
  0x5c   :  { %v130_v39 = vadd.f32 0.1064488, %v129_v38 }
  0x5e   :  { %v131_v40 = vmul.f32 %v130_v39, %v122_v31 }
  0x60   :  { %v132_v41 = vadd.f32 -0.14207031, %v131_v40 }
  0x62   :  { %v133_v42 = vmul.f32 %v132_v41, %v122_v31 }
  0x64   :  { %v134_v43 = vadd.f32 0.19993454, %v133_v42 }
  0x66   :  { %v135_v44 = vmul.f32 %v134_v43, %v122_v31 }
  0x68   :  { %v136_v45 = vadd.f32 -0.33333147, %v135_v44 }
  0x6a   :  { %v137_v46 = vmul.f32 %v136_v45, %v122_v31 }
  0x6c   :  { %v138_v47 = vmul.f32 %v137_v46, %v121_v29 }
  0x6e   :  { %v139_v48 = vadd.f32 %v138_v47, %v121_v29 }
  0x70   :  { %v141_v49 = vsub.f32 1.5707964, %v139_v48 }
  0x72   :  { %v142_v50 = vsel %vm140_vm2, %v141_v49, %v139_v48 }
  0x73   :  { %v144_v51 = vsub.f32 3.1415927, %v142_v50 }
  0x75   :  { %v145_v52 = vsel %vm143_vm5, %v144_v51, %v142_v50 }
  0x76   :  { %v147_v55 = vsel %vm146_vm8, 0.0, %v145_v52 }
  0x77   :  { %v151_v56 = vsel %vm150_vm9, nan, %v147_v55 }
  0x78   :  { %v157_v58 = vsel %vm156_vm10, %v153_v54, %v151_v56 }
  0x79   :  { %v158_v59 = vand.u32 2147483647, %v157_v58 }
  0x7b   :  { %v160_v60 = vor.u32 %v159_v57, %v158_v59 }
  0x7d   :  { %v161_v61 = vmul.f32 2.0, %v160_v60 }
  0x7f   :  { %v163_v62 = vmul.f32 %v161_v61, %v161_v61 }
  0x81   :  { %200 = vadd.xlane.f32.xlu0 %v163_v62 }
  0xa3   :  { %v191_v63 = vpop.xlane.xlu0 %190 }
  0xa4   :  { %v192_v0 = vrot.slane %v191_v63, 4 }
  0xa6   :  { %v193_v1 = vadd.f32 %v192_v0, %v191_v63 }
  0xa8   :  { %v194_v2 = vrot.slane %v193_v1, 2  ;;  %v211_v6 = vpop.xlane.xlu1 %210 }
  0xa9   :  { %v212_v8 = vrot.slane %v211_v6, 4 }
  0xaa   :  { %v195_v3 = vadd.f32 %v194_v2, %v193_v1 }
  0xab   :  { %v213_v10 = vadd.f32 %v212_v8, %v211_v6 }
  0xac   :  { %v196_v4 = vrot.slane %v195_v3, 1  ;;  %v221_v7 = vpop.xlane.xlu1 %220 }
  0xad   :  { %v222_v9 = vrot.slane %v221_v7, 4  ;;  %v214_v12 = vrot.slane %v213_v10, 2 }
  0xae   :  { %v197_v5 = vadd.f32 %v196_v4, %v195_v3 }
  0xaf   :  { %v223_v11 = vadd.f32 %v222_v9, %v221_v7  ;;  %v215_v17 = vadd.f32 %v214_v12, %v213_v10 }
  0xb0   :  { %259 = vpush %v197_v5 }
  0xb1   :  { %v224_v14 = vrot.slane %v223_v11, 2  ;;  %v216_v21 = vrot.slane %v215_v17, 1 }
  0xb3   :  { %v225_v18 = vadd.f32 %v224_v14, %v223_v11  ;;  %v217_v26 = vadd.f32 %v216_v21, %v215_v17 }
  0xb5   :  { %v226_v24 = vrot.slane %v225_v18, 1 }
  0xb7   :  { %v227_v27 = vadd.f32 %v226_v24, %v225_v18 }
  0xe1   :  { %s260_s0 = spop %259 }
  0xe2   :  { %v241_v34 = vstv %s260_s0 }
 0x10a   :  { %v201_v13 = vpop.xlane.xlu0 %200 }
 0x10b   :  { %v202_v15 = vrot.slane %v201_v13, 4 }
 0x10d   :  { %v203_v16 = vadd.f32 %v202_v15, %v201_v13 }
 0x10f   :  { %v204_v19 = vrot.slane %v203_v16, 2 }
 0x111   :  { %v205_v20 = vadd.f32 %v204_v19, %v203_v16 }
 0x113   :  { %v206_v22 = vrot.slane %v205_v20, 1 }
 0x115   :  { %v207_v25 = vadd.f32 %v206_v22, %v205_v20 }
 0x117   :  { %261 = vpush %v207_v25 }
 0x118   :  { %263 = vpush %v217_v26 }
 0x119   :  { %265 = vpush %v227_v27 }
 0x148   :  { %s262_s13 = spop %261 }
 0x149   :  { %s264_s14 = spop %263  ;;  %v239_v33 = vstv %s262_s13 }
 0x14a   :  { %v237_v23 = vstv %s264_s14  ;;  %s266_s15 = spop %265 }
 0x14b   :  { %v235_v29 = vstv %s266_s15 }
 0x14c   :  { %v236_v31 = vsel %vm234_vm11, %v235_v29, 0.0 }
 0x14d   :  { %v238_v32 = vsel %vm233_vm12, %v237_v23, %v236_v31 }
 0x14e   :  { %v240_v35 = vsel %vm232_vm13, %v239_v33, %v238_v32 }
 0x14f   :  { %v242_v36 = vsel %vm231_vm14, %v241_v34, %v240_v35 }
 0x150   :  { %243 = vst [vmem:[#allocation9] sm:$0xff] %v242_v36 }
 0x151   :  { %307 = shalt.err (!%p304_p9)
}
 0x152   :  { %253 = dma.vmem_to_hbm [thread:$0]  %s251_s17, 128, %s342_s1, [#allocation8]  }
 0x153   :  { %318 = dma.done.wait [#allocation8], 128  }
 0x154   :  { %319 = vsyncadd [#allocation8], 4294967168 }
 0x155   :  { %257 = vsyncpa [#allocation7], 1 }
 0x156   :  { %258 = vsyncpa [#allocation8], 1 }

</bundles_post_ra>
